<compile_context>
chip_gen: v5e
topology: v5e:2x2
jax: 0.10.0
libtpu: 0.0.40
codegen_flags: <defaults>
</compile_context>

<pallas_src>
import functools

import jax
import jax.numpy as jnp
from jax.experimental import pallas as pl
from jax.experimental.pallas import tpu as pltpu


# ---------------------------------------------------------------------------
# Kernels
# ---------------------------------------------------------------------------

def _se_fused_kernel(x_ref, w1_ref, w2_ref, o_ref, *, inv_hw):
    """Path A: one (1, HW, C) batch slice per grid step, fully fused."""
    x = x_ref[...]                                              # (1, HW, C)
    y = jnp.sum(x, axis=1) * inv_hw                             # (1, C)
    h = jnp.maximum(
        jnp.dot(y, w1_ref[...], preferred_element_type=jnp.float32), 0.0)
    s = jax.nn.sigmoid(
        jnp.dot(h, w2_ref[...], preferred_element_type=jnp.float32))   # (1, C)
    o_ref[...] = (x * s[:, None, :]).astype(o_ref.dtype)


def _pool_excite_kernel(x_ref, w1_ref, w2_ref, s_ref, acc_ref, *, inv_hw):
    """Path B pass 1: accumulate spatial sum over HW tiles; run MLP at the end.

    Spatial padding (if any) is zero-filled by the wrapper, so it does not
    perturb the sum; the mean uses the true 1/(H*W).
    """
    t = pl.program_id(1)

    @pl.when(t == 0)
    def _():
        acc_ref[...] = jnp.zeros_like(acc_ref)

    acc_ref[...] += jnp.sum(x_ref[...], axis=1)                 # (1, C)

    @pl.when(t == pl.num_programs(1) - 1)
    def _():
        y = acc_ref[...] * inv_hw                               # (1, C)
        h = jnp.maximum(
            jnp.dot(y, w1_ref[...], preferred_element_type=jnp.float32), 0.0)
        s = jax.nn.sigmoid(
            jnp.dot(h, w2_ref[...], preferred_element_type=jnp.float32))
        s_ref[...] = s[:, None, :]                              # (1, 1, C)


def _scale_kernel(s_ref, x_ref, o_ref):
    """Path B pass 2: out = x * s, gate broadcast along the sublane axis."""
    o_ref[...] = (x_ref[...] * s_ref[...]).astype(o_ref.dtype)  # (1,t,C)*(1,1,C)


# ---------------------------------------------------------------------------
# Wrapper
# ---------------------------------------------------------------------------

_VMEM_LIMIT_BYTES = 32 * 1024 * 1024   # safe on v5e/v6e/v7x (raises v5e default)


def _round_up(n, m):
    return (n + m - 1) // m * m


def se_block(x, w1, w2, *, max_fused_block_bytes=4 * 1024 * 1024, hw_tile=None):
    """SEBlock forward.

    x : (B, C, H, W) float32 (NCHW, PyTorch layout)
    w1: (R, C) float32  -- torch fc[0].weight (out, in), bias-free
    w2: (C, R) float32  -- torch fc[2].weight (out, in), bias-free
    """
    B, C, H, W = x.shape
    R = w1.shape[0]
    HW = H * W
    dtype = x.dtype
    itemsize = jnp.dtype(dtype).itemsize

    # NHWC-style slab: channels on the lane axis (lane-dense stores).
    x_nhwc = jnp.transpose(x, (0, 2, 3, 1)).reshape(B, HW, C)
    w1_t = jnp.transpose(w1)   # (C, R)
    w2_t = jnp.transpose(w2)   # (R, C)
    inv_hw = 1.0 / float(HW)

    block_bytes = HW * C * itemsize

    if block_bytes <= max_fused_block_bytes:
        # -------- Path A: fused single pass, grid over batch ------------
        out_nhwc = pl.pallas_call(
            functools.partial(_se_fused_kernel, inv_hw=inv_hw),
            out_shape=jax.ShapeDtypeStruct((B, HW, C), dtype),
            grid_spec=pltpu.PrefetchScalarGridSpec(
                num_scalar_prefetch=0,
                grid=(B,),
                in_specs=[
                    pl.BlockSpec((1, HW, C), lambda b: (b, 0, 0)),
                    pl.BlockSpec((C, R), lambda b: (0, 0)),
                    pl.BlockSpec((R, C), lambda b: (0, 0)),
                ],
                out_specs=pl.BlockSpec((1, HW, C), lambda b: (b, 0, 0)),
            ),
            compiler_params=pltpu.CompilerParams(
                dimension_semantics=("parallel",),
                vmem_limit_bytes=_VMEM_LIMIT_BYTES),
            cost_estimate=pl.CostEstimate(
                flops=2 * B * HW * C + 4 * B * C * R,
                transcendentals=B * C,
                bytes_accessed=2 * B * HW * C * itemsize),
        )(x_nhwc, w1_t, w2_t)
    else:
        # -------- Path B: two tiled, pipelined passes --------------------
        if hw_tile is None:
            target_bytes = 2 * 1024 * 1024          # per-step block budget
            hw_tile = (target_bytes // (C * itemsize)) // 8 * 8
        hw_tile = max(8, (hw_tile // 8) * 8)
        hw_tile = min(hw_tile, _round_up(HW, 8))
        n_t = (HW + hw_tile - 1) // hw_tile
        hw_pad = n_t * hw_tile
        if hw_pad != HW:
            # Zero padding: harmless for the sum-pool, sliced off at the end.
            x_nhwc = jnp.pad(x_nhwc, ((0, 0), (0, hw_pad - HW), (0, 0)))

        # Pass 1: tiled pooled-mean + excitation -> per-channel gate s.
        s = pl.pallas_call(
            functools.partial(_pool_excite_kernel, inv_hw=inv_hw),
            out_shape=jax.ShapeDtypeStruct((B, 1, C), jnp.float32),
            grid_spec=pltpu.PrefetchScalarGridSpec(
                num_scalar_prefetch=0,
                grid=(B, n_t),
                in_specs=[
                    pl.BlockSpec((1, hw_tile, C), lambda b, i: (b, i, 0)),
                    pl.BlockSpec((C, R), lambda b, i: (0, 0)),
                    pl.BlockSpec((R, C), lambda b, i: (0, 0)),
                ],
                out_specs=pl.BlockSpec((1, 1, C), lambda b, i: (b, 0, 0)),
                scratch_shapes=[pltpu.VMEM((1, C), jnp.float32)],
            ),
            compiler_params=pltpu.CompilerParams(
                dimension_semantics=("parallel", "arbitrary"),
                vmem_limit_bytes=_VMEM_LIMIT_BYTES),
            cost_estimate=pl.CostEstimate(
                flops=B * hw_pad * C + 4 * B * C * R,
                transcendentals=B * C,
                bytes_accessed=B * hw_pad * C * itemsize),
        )(x_nhwc, w1_t, w2_t)

        # Pass 2: tiled elementwise scale.
        out_nhwc = pl.pallas_call(
            _scale_kernel,
            out_shape=jax.ShapeDtypeStruct((B, hw_pad, C), dtype),
            grid_spec=pltpu.PrefetchScalarGridSpec(
                num_scalar_prefetch=0,
                grid=(B, n_t),
                in_specs=[
                    pl.BlockSpec((1, 1, C), lambda b, i: (b, 0, 0)),
                    pl.BlockSpec((1, hw_tile, C), lambda b, i: (b, i, 0)),
                ],
                out_specs=pl.BlockSpec((1, hw_tile, C), lambda b, i: (b, i, 0)),
            ),
            compiler_params=pltpu.CompilerParams(
                dimension_semantics=("parallel", "parallel"),
                vmem_limit_bytes=_VMEM_LIMIT_BYTES),
            cost_estimate=pl.CostEstimate(
                flops=B * hw_pad * C,
                transcendentals=0,
                bytes_accessed=2 * B * hw_pad * C * itemsize),
        )(s, x_nhwc)

        if hw_pad != HW:
            out_nhwc = out_nhwc[:, :HW, :]

    return jnp.transpose(out_nhwc.reshape(B, H, W, C), (0, 3, 1, 2))


# ---------------------------------------------------------------------------
# Test
# ---------------------------------------------------------------------------

def _reference(x, w1, w2):
    y = jnp.mean(x, axis=(2, 3))                  # (B, C)
    h = jnp.maximum(y @ w1.T, 0.0)                # (B, R)
    s = jax.nn.sigmoid(h @ w2.T)                  # (B, C)
    return x * s[:, :, None, None]


if __name__ == "__main__":
    key = jax.random.PRNGKey(0)
    kx, k1, k2, kx2 = jax.random.split(key, 4)

    B, C, H, W = 2, 4, 16, 16
    reduction = 16
    R = max(C // reduction, 8)   # = 8

    x = jax.random.normal(kx, (B, C, H, W), dtype=jnp.float32)
    # torch nn.Linear layout: weight is (out_features, in_features), no bias.
    w1 = jax.random.normal(k1, (R, C), dtype=jnp.float32) * 0.1   # fc[0].weight
    w2 = jax.random.normal(k2, (C, R), dtype=jnp.float32) * 0.1   # fc[2].weight

    ref = _reference(x, w1, w2)

    # Path A: fused per-batch blocks.
    out_a = se_block(x, w1, w2)
    jax.block_until_ready(out_a)
    assert jnp.allclose(out_a, ref, atol=1e-5, rtol=1e-5), "Path A mismatch"

    # Path B: forced two-pass tiled pipeline (exercises the HW-tile grid).
    out_b = se_block(x, w1, w2, max_fused_block_bytes=0, hw_tile=64)
    jax.block_until_ready(out_b)
    assert jnp.allclose(out_b, ref, atol=1e-5, rtol=1e-5), "Path B mismatch"

    # Path B with spatial size not a multiple of the tile (padding path).
    x2 = jax.random.normal(kx2, (B, C, 10, 10), dtype=jnp.float32)
    out_c = se_block(x2, w1, w2, max_fused_block_bytes=0, hw_tile=64)
    jax.block_until_ready(out_c)
    ref2 = _reference(x2, w1, w2)
    assert jnp.allclose(out_c, ref2, atol=1e-5, rtol=1e-5), "Path B pad mismatch"

    print("KERNEL_OK")
</pallas_src>

<mosaic_0001>
module attributes {stable_mosaic.version = 11 : i64} {
  func.func @_se_fused_kernel(%arg0: i32, %arg1: memref<1x256x4xf32, #tpu.memory_space<vmem>>, %arg2: memref<4x8xf32, #tpu.memory_space<vmem>>, %arg3: memref<8x4xf32, #tpu.memory_space<vmem>>, %arg4: memref<1x256x4xf32, #tpu.memory_space<vmem>>) attributes {dimension_semantics = [#tpu.dimension_semantics<parallel>], iteration_bounds = array<i64: 2>, scalar_prefetch = 0 : i64, scratch_operands = 0 : i64, tpu.core_type = #tpu.core_type<tc>, window_params = [{transform_indices = @transform_0, window_bounds = array<i64: 1, 256, 4>}, {pipeline_mode = #tpu.pipeline_mode<synchronous>, transform_indices = @transform_1, window_bounds = array<i64: 4, 8>}, {pipeline_mode = #tpu.pipeline_mode<synchronous>, transform_indices = @transform_2, window_bounds = array<i64: 8, 4>}, {transform_indices = @transform_3, window_bounds = array<i64: 1, 256, 4>}]} {
    %c0 = arith.constant 0 : index
    %c0_0 = arith.constant 0 : index
    %c0_1 = arith.constant 0 : index
    %0 = vector.load %arg1[%c0, %c0_0, %c0_1] : memref<1x256x4xf32, #tpu.memory_space<vmem>>, vector<1x256x4xf32>
    %cst = arith.constant dense<0.000000e+00> : vector<1x4xf32>
    %1 = vector.multi_reduction <add>, %0, %cst [1] : vector<1x256x4xf32> to vector<1x4xf32>
    %cst_2 = arith.constant 3.906250e-03 : f32
    %2 = vector.broadcast %cst_2 : f32 to vector<1x4xf32>
    %3 = arith.mulf %1, %2 : vector<1x4xf32>
    %c0_3 = arith.constant 0 : index
    %c0_4 = arith.constant 0 : index
    %4 = vector.load %arg2[%c0_3, %c0_4] : memref<4x8xf32, #tpu.memory_space<vmem>>, vector<4x8xf32>
    %cst_5 = arith.constant dense<0.000000e+00> : vector<1x8xf32>
    %5 = tpu.matmul %3, %4, %cst_5 {dimension_numbers = #tpu.dot_dimension_numbers<[1], [0], [0], [1], [0, 0, 1, 1], [], []>} : vector<1x4xf32>, vector<4x8xf32>, vector<1x8xf32> -> vector<1x8xf32>
    %cst_6 = arith.constant 0.000000e+00 : f32
    %6 = vector.broadcast %cst_6 : f32 to vector<1x8xf32>
    %7 = arith.maximumf %5, %6 : vector<1x8xf32>
    %c0_7 = arith.constant 0 : index
    %c0_8 = arith.constant 0 : index
    %8 = vector.load %arg3[%c0_7, %c0_8] : memref<8x4xf32, #tpu.memory_space<vmem>>, vector<8x4xf32>
    %cst_9 = arith.constant dense<0.000000e+00> : vector<1x4xf32>
    %9 = tpu.matmul %7, %8, %cst_9 {dimension_numbers = #tpu.dot_dimension_numbers<[1], [0], [0], [1], [0, 0, 1, 1], [], []>} : vector<1x8xf32>, vector<8x4xf32>, vector<1x4xf32> -> vector<1x4xf32>
    %10 = arith.negf %9 : vector<1x4xf32>
    %11 = math.exp %10 : vector<1x4xf32>
    %cst_10 = arith.constant 1.000000e+00 : f32
    %12 = vector.broadcast %cst_10 : f32 to vector<1x4xf32>
    %13 = arith.addf %12, %11 : vector<1x4xf32>
    %14 = arith.divf %12, %13 : vector<1x4xf32>
    %15 = vector.shape_cast %14 : vector<1x4xf32> to vector<1x1x4xf32>
    %16 = vector.broadcast %15 : vector<1x1x4xf32> to vector<1x256x4xf32>
    %17 = arith.mulf %0, %16 : vector<1x256x4xf32>
    %c0_11 = arith.constant 0 : index
    %c0_12 = arith.constant 0 : index
    %c0_13 = arith.constant 0 : index
    %18 = vector.load %arg4[%c0_11, %c0_12, %c0_13] : memref<1x256x4xf32, #tpu.memory_space<vmem>>, vector<1x256x4xf32>
    tpu.vector_store %arg4[%c0_11, %c0_12, %c0_13], %17 {strides = array<i32>} : memref<1x256x4xf32, #tpu.memory_space<vmem>>, vector<1x256x4xf32>,
    return
  }
  func.func @transform_0(%arg0: i32) -> (i32, i32, i32) {
    %c0_i32 = arith.constant 0 : i32
    %c0_i32_0 = arith.constant 0 : i32
    %c0_i32_1 = arith.constant 0 : i32
    return %arg0, %c0_i32, %c0_i32_0 : i32, i32, i32
  }
  func.func @transform_1(%arg0: i32) -> (i32, i32) {
    %c0_i32 = arith.constant 0 : i32
    %c0_i32_0 = arith.constant 0 : i32
    %c0_i32_1 = arith.constant 0 : i32
    return %c0_i32, %c0_i32_0 : i32, i32
  }
  func.func @transform_2(%arg0: i32) -> (i32, i32) {
    %c0_i32 = arith.constant 0 : i32
    %c0_i32_0 = arith.constant 0 : i32
    %c0_i32_1 = arith.constant 0 : i32
    return %c0_i32, %c0_i32_0 : i32, i32
  }
  func.func @transform_3(%arg0: i32) -> (i32, i32, i32) {
    %c0_i32 = arith.constant 0 : i32
    %c0_i32_0 = arith.constant 0 : i32
    %c0_i32_1 = arith.constant 0 : i32
    return %arg0, %c0_i32, %c0_i32_0 : i32, i32, i32
  }
}

</mosaic_0001>

<bundles_post_ra>
// kernel: tpu_custom_call.1
= control target key start
LH: loop header
LB: loop body
LE: loop exit
PB: predicated region body
PF: predicated region fallthrough
CT: control target
= control target key end

     0   :  { %s524_s12 = smov 0   ;;  %s815_s0 = inlined_call_operand.vmem [shape: f32[2,256,4], index: 0, kind: input, shape index: {}]   ;;  %s816_s1 = inlined_call_operand.vmem [shape: f32[4,8], index: 1, kind: input, shape index: {}]   ;;  %s817_s2 = inlined_call_operand.vmem [shape: f32[8,4], index: 2, kind: input, shape index: {}]   ;;  %s818_s3 = inlined_call_operand.vmem [shape: f32[2,256,4], index: 3, kind: output, shape index: {}]  }
   0x1 LB: > { %s467_s13 = sadd.s32 4294967295, %s502_s12   ;;  %p471_p0 = scmp.ge.s32.totalorder %s502_s12, 1  ;;  %s502_s12 = sphi %s524_s12, %s13_s12  }
   0x2   : > { %p137_p1 = scmp.lt.s32.totalorder %s502_s12, 3 }
   0x4   : > { %p138_p2 = pnand %p471_p0, %p137_p1 }
   0x5   : > { %p161_p3 = scmp.lt.s32.totalorder (!%p138_p2), %s467_s13, 1 }
   0x6   : > { %141 = sbr.rel (%p138_p2) target bundleno = 410 (0x19a), region = 32 }
   0xb   : > { %v274_v0 = vld [vmem:[%s816_s1] sm:$0xf]  ;;  %vm278_vm0 = vcmask 1043456   ;;  %s820_s13 = smov (!%p161_p3, %s467_s13), 1  ;;  %vm203_vm1 = vcmask 31744   ;;  %vm304_vm2 = vcmask 64512  }
   0xc   : > { %476 = vmatpush.msk.msra.mxu0 %vm278_vm0, %v274_v0  ;;  %s482_s16 = sshll.u32 %s820_s13, 8 }
   0xd   : > { %s543_s19 = scalar_lea.vmem %s815_s0, %s482_s16  ;;  %s714_s24 = scalar_lea.vmem %s818_s3, %s482_s16 }
   0xe   : > { %v546_v1 = vld [vmem:[%s543_s19] sm:$0xff]  ;;  %v549_v2 = vld [vmem:[%s543_s19 + $0x8] sm:$0xff]  ;;  %v552_v3 = vld [vmem:[%s543_s19 + $0x10] sm:$0xff] }
   0xf   : > { %v555_v4 = vld [vmem:[%s543_s19 + $0x18] sm:$0xff]  ;;  %v204_v5 = vsel %vm203_vm1, %v546_v1, 0.0  ;;  %v205_v6 = vsel %vm203_vm1, %v549_v2, 0.0  ;;  %v207_v7 = vsel %vm203_vm1, %v552_v3, 0.0  ;;  %v564_v8 = vld [vmem:[%s543_s19 + $0x20] sm:$0xff]  ;;  %v569_v11 = vld [vmem:[%s543_s19 + $0x28] sm:$0xff] }
  0x10   : > { %v206_v9 = vadd.f32 %v205_v6, %v204_v5  ;;  %v209_v10 = vsel %vm203_vm1, %v555_v4, 0.0  ;;  %v211_v13 = vsel %vm203_vm1, %v564_v8, 0.0  ;;  %v574_v14 = vld [vmem:[%s543_s19 + $0x30] sm:$0xff]  ;;  %v213_v16 = vsel %vm203_vm1, %v569_v11, 0.0  ;;  %v579_v17 = vld [vmem:[%s543_s19 + $0x38] sm:$0xff]  ;;  %v584_v20 = vld [vmem:[%s543_s19 + $0x40] sm:$0xff] }
  0x11   : > { %v215_v19 = vsel %vm203_vm1, %v574_v14, 0.0  ;;  %v217_v22 = vsel %vm203_vm1, %v579_v17, 0.0  ;;  %v589_v23 = vld [vmem:[%s543_s19 + $0x48] sm:$0xff]  ;;  %v219_v25 = vsel %vm203_vm1, %v584_v20, 0.0  ;;  %v594_v26 = vld [vmem:[%s543_s19 + $0x50] sm:$0xff]  ;;  %v599_v29 = vld [vmem:[%s543_s19 + $0x58] sm:$0xff] }
  0x12   : > { %v208_v12 = vadd.f32 %v207_v7, %v206_v9  ;;  %v221_v28 = vsel %vm203_vm1, %v589_v23, 0.0  ;;  %v223_v31 = vsel %vm203_vm1, %v594_v26, 0.0  ;;  %v604_v32 = vld [vmem:[%s543_s19 + $0x60] sm:$0xff]  ;;  %v225_v34 = vsel %vm203_vm1, %v599_v29, 0.0  ;;  %v609_v35 = vld [vmem:[%s543_s19 + $0x68] sm:$0xff]  ;;  %v614_v38 = vld [vmem:[%s543_s19 + $0x70] sm:$0xff] }
  0x13   : > { %v227_v37 = vsel %vm203_vm1, %v604_v32, 0.0  ;;  %v229_v40 = vsel %vm203_vm1, %v609_v35, 0.0  ;;  %v619_v41 = vld [vmem:[%s543_s19 + $0x78] sm:$0xff]  ;;  %v231_v43 = vsel %vm203_vm1, %v614_v38, 0.0  ;;  %v624_v44 = vld [vmem:[%s543_s19 + $0x80] sm:$0xff]  ;;  %v629_v47 = vld [vmem:[%s543_s19 + $0x88] sm:$0xff] }
  0x14   : > { %v210_v15 = vadd.f32 %v209_v10, %v208_v12  ;;  %v233_v46 = vsel %vm203_vm1, %v619_v41, 0.0  ;;  %v235_v49 = vsel %vm203_vm1, %v624_v44, 0.0  ;;  %v634_v50 = vld [vmem:[%s543_s19 + $0x90] sm:$0xff]  ;;  %v237_v52 = vsel %vm203_vm1, %v629_v47, 0.0  ;;  %v639_v53 = vld [vmem:[%s543_s19 + $0x98] sm:$0xff]  ;;  %v644_v56 = vld [vmem:[%s543_s19 + $0xa0] sm:$0xff] }
  0x15   : > { %v239_v55 = vsel %vm203_vm1, %v634_v50, 0.0  ;;  %v241_v58 = vsel %vm203_vm1, %v639_v53, 0.0  ;;  %v649_v59 = vld [vmem:[%s543_s19 + $0xa8] sm:$0xff]  ;;  %v243_v61 = vsel %vm203_vm1, %v644_v56, 0.0  ;;  %v654_v62 = vld [vmem:[%s543_s19 + $0xb0] sm:$0xff]  ;;  %v659_v5 = vld [vmem:[%s543_s19 + $0xb8] sm:$0xff] }
  0x16   : > { %v212_v18 = vadd.f32 %v211_v13, %v210_v15  ;;  %v245_v0 = vsel %vm203_vm1, %v649_v59, 0.0  ;;  %v247_v7 = vsel %vm203_vm1, %v654_v62, 0.0  ;;  %v664_v9 = vld [vmem:[%s543_s19 + $0xc0] sm:$0xff]  ;;  %v249_v12 = vsel %vm203_vm1, %v659_v5, 0.0  ;;  %v669_v13 = vld [vmem:[%s543_s19 + $0xc8] sm:$0xff] }
  0x18   : > { %v214_v21 = vadd.f32 %v213_v16, %v212_v18  ;;  %v251_v16 = vsel %vm203_vm1, %v664_v9, 0.0  ;;  %v674_v18 = vld [vmem:[%s543_s19 + $0xd0] sm:$0xff] }
  0x1a   : > { %v216_v24 = vadd.f32 %v215_v19, %v214_v21  ;;  %v253_v21 = vsel %vm203_vm1, %v669_v13, 0.0 }
  0x1c   : > { %v218_v27 = vadd.f32 %v217_v22, %v216_v24  ;;  %v679_v22 = vld [vmem:[%s543_s19 + $0xd8] sm:$0xff] }
  0x1e   : > { %v220_v30 = vadd.f32 %v219_v25, %v218_v27  ;;  %v255_v25 = vsel %vm203_vm1, %v674_v18, 0.0  ;;  %v684_v27 = vld [vmem:[%s543_s19 + $0xe0] sm:$0xff] }
  0x20   : > { %v222_v33 = vadd.f32 %v221_v28, %v220_v30  ;;  %v257_v30 = vsel %vm203_vm1, %v679_v22, 0.0 }
  0x22   : > { %v224_v36 = vadd.f32 %v223_v31, %v222_v33  ;;  %v689_v31 = vld [vmem:[%s543_s19 + $0xe8] sm:$0xff] }
  0x24   : > { %v226_v39 = vadd.f32 %v225_v34, %v224_v36  ;;  %v259_v34 = vsel %vm203_vm1, %v684_v27, 0.0  ;;  %v694_v36 = vld [vmem:[%s543_s19 + $0xf0] sm:$0xff] }
  0x26   : > { %v228_v42 = vadd.f32 %v227_v37, %v226_v39  ;;  %v261_v39 = vsel %vm203_vm1, %v689_v31, 0.0 }
  0x28   : > { %v230_v45 = vadd.f32 %v229_v40, %v228_v42  ;;  %v699_v40 = vld [vmem:[%s543_s19 + $0xf8] sm:$0xff] }
  0x2a   : > { %v232_v48 = vadd.f32 %v231_v43, %v230_v45  ;;  %v263_v43 = vsel %vm203_vm1, %v694_v36, 0.0 }
  0x2c   : > { %v234_v51 = vadd.f32 %v233_v46, %v232_v48  ;;  %v265_v46 = vsel %vm203_vm1, %v699_v40, 0.0 }
  0x2e   : > { %v236_v54 = vadd.f32 %v235_v49, %v234_v51 }
  0x30   : > { %v238_v57 = vadd.f32 %v237_v52, %v236_v54 }
  0x32   : > { %v240_v60 = vadd.f32 %v239_v55, %v238_v57 }
  0x34   : > { %v242_v63 = vadd.f32 %v241_v58, %v240_v60 }
  0x36   : > { %v244_v6 = vadd.f32 %v243_v61, %v242_v63  ;;  %v303_v61 = vld [vmem:[%s817_s2] sm:$0xff] }
  0x37   : > { %323 = vmatpush.msra.mxu1 %v303_v61 }
  0x38   : > { %v246_v10 = vadd.f32 %v245_v0, %v244_v6 }
  0x3a   : > { %v248_v15 = vadd.f32 %v247_v7, %v246_v10 }
  0x3c   : > { %v250_v19 = vadd.f32 %v249_v12, %v248_v15 }
  0x3e   : > { %v252_v24 = vadd.f32 %v251_v16, %v250_v19 }
  0x40   : > { %v254_v28 = vadd.f32 %v253_v21, %v252_v24 }
  0x42   : > { %v256_v33 = vadd.f32 %v255_v25, %v254_v28 }
  0x44   : > { %v258_v37 = vadd.f32 %v257_v30, %v256_v33 }
  0x46   : > { %v260_v42 = vadd.f32 %v259_v34, %v258_v37 }
  0x48   : > { %v262_v45 = vadd.f32 %v261_v39, %v260_v42 }
  0x4a   : > { %v264_v48 = vadd.f32 %v263_v43, %v262_v45 }
  0x4c   : > { %v266_v49 = vadd.f32 %v265_v46, %v264_v48 }
  0x4e   : > { %v267_v51 = vrot.slane %v266_v49, 4 }
  0x50   : > { %v268_v52 = vadd.f32 %v267_v51, %v266_v49 }
  0x52   : > { %v269_v54 = vrot.slane %v268_v52, 2 }
  0x54   : > { %v270_v55 = vadd.f32 %v269_v54, %v268_v52 }
  0x56   : > { %v271_v57 = vrot.slane %v270_v55, 1 }
  0x58   : > { %v272_v58 = vadd.f32 %v271_v57, %v270_v55 }
  0x5a   : > { %v273_v60 = vmul.f32 0.00390625, %v272_v58 }
  0x5c   : > { %477 = vmatmul.msk.f32.vlgmr.msra.gmra.mxu0 %vm203_vm1, %v273_v60 }
  0xd9   : > { %v299_v63 = vpop.f32.mrf.mxu0 }
  0xda   : > { %v302_v0 = vmax.f32 %v299_v63, 0.0 }
  0xdc   : > { %478 = vmatmul.msk.f32.vlgmr.msra.gmra.mxu1 %vm304_vm2, %v302_v0 }
 0x159   : > { %v325_v6 = vpop.f32.mrf.mxu1 }
 0x15a   : > { %v479_v7 = vmul.f32 -1.442695, %v325_v6 }
 0x15c   : > { %492 = vpow2.f32 %v479_v7 }
 0x162   : > { %v493_v10 = vpop.eup %492 }
 0x163   : > { %v331_v12 = vadd.f32 1.0, %v493_v10 }
 0x165   : > { %494 = vrcp.f32 %v331_v12  ;;  %v343_v21 = vand.u32 2147483648, %v331_v12  ;;  %v341_v25 = vand.u32 2147483647, %v331_v12  ;;  %vm337_vm4 = vweird.f32 %v331_v12 }
 0x167   : > { %v344_v30 = vor.u32 1.1754944e-38, %v343_v21  ;;  %vm342_vm6 = vcmp.eq.f32.partialorder %v341_v25, 8.507059e+37 }
 0x16b   : > { %v495_v15 = vpop.eup %494 }
 0x16c   : > { %v333_v16 = vmul.f32 %v495_v15, %v331_v12  ;;  %vm338_vm3 = vweird.f32 %v495_v15 }
 0x16d   : > { %vm339_vm5 = vmor %vm337_vm4, %vm338_vm3 }
 0x16e   : > { %v334_v19 = vsub.f32 1.0, %v333_v16 }
 0x170   : > { %v335_v24 = vmul.f32 %v495_v15, %v334_v19 }
 0x172   : > { %v336_v28 = vadd.f32 %v495_v15, %v335_v24 }
 0x174   : > { %v340_v33 = vsel %vm339_vm5, %v495_v15, %v336_v28 }
 0x175   : > { %v345_v34 = vsel %vm342_vm6, %v344_v30, %v340_v33 }
 0x176   : > { %v347_v37 = vperm.slane %v345_v34, 0 }
 0x178   : > { %v348_v39 = vmul.f32 %v347_v37, %v546_v1  ;;  %v349_v42 = vmul.f32 %v347_v37, %v549_v2  ;;  %v350_v43 = vmul.f32 %v347_v37, %v552_v3  ;;  %v351_v45 = vmul.f32 %v347_v37, %v555_v4 }
 0x179   : > { %v352_v46 = vmul.f32 %v347_v37, %v564_v8  ;;  %v353_v48 = vmul.f32 %v347_v37, %v569_v11  ;;  %v354_v1 = vmul.f32 %v347_v37, %v574_v14  ;;  %v355_v2 = vmul.f32 %v347_v37, %v579_v17 }
 0x17a   : > { %380 = vst.msk [vmem:[%s714_s24] sm:$0xff] %vm203_vm1, %v348_v39  ;;  %v356_v3 = vmul.f32 %v347_v37, %v584_v20  ;;  %v357_v4 = vmul.f32 %v347_v37, %v589_v23  ;;  %v358_v8 = vmul.f32 %v347_v37, %v594_v26  ;;  %v359_v11 = vmul.f32 %v347_v37, %v599_v29 }
 0x17b   : > { %381 = vst.msk [vmem:[%s714_s24 + $0x8] sm:$0xff] %vm203_vm1, %v349_v42  ;;  %v360_v14 = vmul.f32 %v347_v37, %v604_v32  ;;  %v361_v17 = vmul.f32 %v347_v37, %v609_v35  ;;  %v362_v20 = vmul.f32 %v347_v37, %v614_v38  ;;  %v363_v23 = vmul.f32 %v347_v37, %v619_v41 }
 0x17c   : > { %382 = vst.msk [vmem:[%s714_s24 + $0x10] sm:$0xff] %vm203_vm1, %v350_v43  ;;  %v364_v26 = vmul.f32 %v347_v37, %v624_v44  ;;  %v365_v29 = vmul.f32 %v347_v37, %v629_v47  ;;  %v366_v32 = vmul.f32 %v347_v37, %v634_v50  ;;  %v367_v35 = vmul.f32 %v347_v37, %v639_v53 }
 0x17d   : > { %383 = vst.msk [vmem:[%s714_s24 + $0x18] sm:$0xff] %vm203_vm1, %v351_v45  ;;  %v368_v38 = vmul.f32 %v347_v37, %v644_v56  ;;  %v369_v41 = vmul.f32 %v347_v37, %v649_v59  ;;  %v370_v44 = vmul.f32 %v347_v37, %v654_v62  ;;  %v371_v47 = vmul.f32 %v347_v37, %v659_v5 }
 0x17e   : > { %384 = vst.msk [vmem:[%s714_s24 + $0x20] sm:$0xff] %vm203_vm1, %v352_v46  ;;  %v372_v50 = vmul.f32 %v347_v37, %v664_v9  ;;  %v373_v53 = vmul.f32 %v347_v37, %v669_v13  ;;  %v374_v56 = vmul.f32 %v347_v37, %v674_v18  ;;  %v375_v59 = vmul.f32 %v347_v37, %v679_v22 }
 0x17f   : > { %385 = vst.msk [vmem:[%s714_s24 + $0x28] sm:$0xff] %vm203_vm1, %v353_v48  ;;  %v376_v62 = vmul.f32 %v347_v37, %v684_v27  ;;  %v377_v5 = vmul.f32 %v347_v37, %v689_v31  ;;  %v378_v9 = vmul.f32 %v347_v37, %v694_v36  ;;  %v379_v13 = vmul.f32 %v347_v37, %v699_v40 }
 0x180   : > { %386 = vst.msk [vmem:[%s714_s24 + $0x30] sm:$0xff] %vm203_vm1, %v354_v1 }
 0x181   : > { %387 = vst.msk [vmem:[%s714_s24 + $0x38] sm:$0xff] %vm203_vm1, %v355_v2 }
 0x182   : > { %388 = vst.msk [vmem:[%s714_s24 + $0x40] sm:$0xff] %vm203_vm1, %v356_v3 }
 0x183   : > { %389 = vst.msk [vmem:[%s714_s24 + $0x48] sm:$0xff] %vm203_vm1, %v357_v4 }
 0x184   : > { %390 = vst.msk [vmem:[%s714_s24 + $0x50] sm:$0xff] %vm203_vm1, %v358_v8 }
 0x185   : > { %391 = vst.msk [vmem:[%s714_s24 + $0x58] sm:$0xff] %vm203_vm1, %v359_v11 }
 0x186   : > { %392 = vst.msk [vmem:[%s714_s24 + $0x60] sm:$0xff] %vm203_vm1, %v360_v14 }
 0x187   : > { %393 = vst.msk [vmem:[%s714_s24 + $0x68] sm:$0xff] %vm203_vm1, %v361_v17 }
 0x188   : > { %394 = vst.msk [vmem:[%s714_s24 + $0x70] sm:$0xff] %vm203_vm1, %v362_v20 }
 0x189   : > { %395 = vst.msk [vmem:[%s714_s24 + $0x78] sm:$0xff] %vm203_vm1, %v363_v23 }
 0x18a   : > { %396 = vst.msk [vmem:[%s714_s24 + $0x80] sm:$0xff] %vm203_vm1, %v364_v26 }
 0x18b   : > { %397 = vst.msk [vmem:[%s714_s24 + $0x88] sm:$0xff] %vm203_vm1, %v365_v29 }
 0x18c   : > { %398 = vst.msk [vmem:[%s714_s24 + $0x90] sm:$0xff] %vm203_vm1, %v366_v32 }
 0x18d   : > { %399 = vst.msk [vmem:[%s714_s24 + $0x98] sm:$0xff] %vm203_vm1, %v367_v35 }
 0x18e   : > { %400 = vst.msk [vmem:[%s714_s24 + $0xa0] sm:$0xff] %vm203_vm1, %v368_v38 }
 0x18f   : > { %401 = vst.msk [vmem:[%s714_s24 + $0xa8] sm:$0xff] %vm203_vm1, %v369_v41 }
 0x190   : > { %402 = vst.msk [vmem:[%s714_s24 + $0xb0] sm:$0xff] %vm203_vm1, %v370_v44 }
 0x191   : > { %403 = vst.msk [vmem:[%s714_s24 + $0xb8] sm:$0xff] %vm203_vm1, %v371_v47 }
 0x192   : > { %404 = vst.msk [vmem:[%s714_s24 + $0xc0] sm:$0xff] %vm203_vm1, %v372_v50 }
 0x193   : > { %405 = vst.msk [vmem:[%s714_s24 + $0xc8] sm:$0xff] %vm203_vm1, %v373_v53 }
 0x194   : > { %406 = vst.msk [vmem:[%s714_s24 + $0xd0] sm:$0xff] %vm203_vm1, %v374_v56 }
 0x195   : > { %407 = vst.msk [vmem:[%s714_s24 + $0xd8] sm:$0xff] %vm203_vm1, %v375_v59 }
 0x196   : > { %408 = vst.msk [vmem:[%s714_s24 + $0xe0] sm:$0xff] %vm203_vm1, %v376_v62 }
 0x197   : > { %409 = vst.msk [vmem:[%s714_s24 + $0xe8] sm:$0xff] %vm203_vm1, %v377_v5 }
 0x198   : > { %410 = vst.msk [vmem:[%s714_s24 + $0xf0] sm:$0xff] %vm203_vm1, %v378_v9 }
 0x199   : > { %411 = vst.msk [vmem:[%s714_s24 + $0xf8] sm:$0xff] %vm203_vm1, %v379_v13 }
 0x19a PF: > { %s13_s12 = sadd.s32 1, %s502_s12  }
 0x19b   : > { %p10_p4 = scmp.ge.s32.totalorder %s13_s12, 4  }
 0x19d   :  { %12 = sbr.rel (!%p10_p4) target bundleno = 1 (0x1), region = 62 }

</bundles_post_ra>
